<compile_context>
chip_gen: v6e
topology: v6e:2x2x1
jax: 0.10.0
libtpu: 0.0.40
codegen_flags: <defaults>
</compile_context>

<pallas_src>
import jax
import jax.numpy as jnp
from jax import lax
from jax.experimental import pallas as pl
from jax.experimental.pallas import tpu as pltpu

TILE = 512   # rows (output pixels) per grid step
N_OFF = 18   # 2 * 3 * 3 offset channels
N_MSK = 9    # 3 * 3 mask channels


# ---------------------------------------------------------------------------
# Kernel 1: fused offset conv (p_conv) + mask conv (m_conv) + sigmoid.
# patches: (TILE, Cin*9) im2col rows; w: (Cin*9, 27) = [p_conv | m_conv];
# columns [0:18] are raw offsets, columns [18:27] get a sigmoid.
# ---------------------------------------------------------------------------
def _offset_mask_kernel(patch_ref, w_ref, b_ref, out_ref):
    y = (jnp.dot(patch_ref[...], w_ref[...], preferred_element_type=jnp.float32)
         + b_ref[...])
    col = lax.broadcasted_iota(jnp.int32, y.shape, 1)
    out_ref[...] = jnp.where(col < N_OFF, y, jax.nn.sigmoid(y))


# ---------------------------------------------------------------------------
# Kernel 2: modulated deformable conv as a single lane-dense matmul.
# samp: (TILE, 9*Cin) pre-sampled (bilinear + mask already folded in glue);
# w: (9*Cin, Cout); out: (TILE, Cout).
# ---------------------------------------------------------------------------
def _deform_matmul_kernel(samp_ref, w_ref, b_ref, out_ref):
    out_ref[...] = (jnp.dot(samp_ref[...], w_ref[...],
                            preferred_element_type=jnp.float32)
                    + b_ref[...])


# ---------------------------------------------------------------------------
# Glue (plain JAX): im2col patch extraction, bilinear gather + fold, reshapes.
# ---------------------------------------------------------------------------
def _pad_rows(a, rp):
    r = a.shape[0]
    if r == rp:
        return a
    return jnp.pad(a, [(0, rp - r)] + [(0, 0)] * (a.ndim - 1))


def _extract_patches_nhwc(x_nhwc, dilation):
    """3x3 dilated patches, padding=dilation, stride=1.
    Returns (B, H, W, Cin*9), flat index = ci*9 + (ky*3+kx) (PyTorch order)."""
    b, h, w, c = x_nhwc.shape
    d = dilation
    xp = jnp.pad(x_nhwc, ((0, 0), (d, d), (d, d), (0, 0)))
    pats = []
    for ky in range(3):
        for kx in range(3):
            pats.append(xp[:, ky * d:ky * d + h, kx * d:kx * d + w, :])
    p = jnp.stack(pats, axis=-1)          # (B, H, W, C, 9)
    return p.reshape(b, h, w, c * 9)


def _deform_samples(x_nhwc, offset, mask):
    """DCNv2 bilinear sampling with bilinear weights, OOB-zeroing and the
    modulation mask all folded here (fused by XLA into the gather epilogue).
    offset: (B,H,W,18) with [0:9]=dy, [9:18]=dx; mask: (B,H,W,9).
    Returns samp: (B, H, W, 9, Cin)."""
    b, h, w, c = x_nhwc.shape
    dy = offset[..., 0:9]
    dx = offset[..., 9:18]
    ky = jnp.arange(3, dtype=jnp.float32) - 1.0
    kyy, kxx = jnp.meshgrid(ky, ky, indexing="ij")
    kyy = kyy.reshape(9)
    kxx = kxx.reshape(9)
    hh = jnp.arange(h, dtype=jnp.float32)[None, :, None, None]
    ww = jnp.arange(w, dtype=jnp.float32)[None, None, :, None]
    py = hh + kyy[None, None, None, :] + dy
    px = ww + kxx[None, None, None, :] + dx
    y0 = jnp.floor(py)
    x0 = jnp.floor(px)
    y1 = y0 + 1.0
    x1 = x0 + 1.0
    wy1 = py - y0
    wy0 = 1.0 - wy1
    wx1 = px - x0
    wx0 = 1.0 - wx1
    ys = jnp.stack([y0, y0, y1, y1], axis=-1)           # (B,H,W,9,4)
    xs = jnp.stack([x0, x1, x0, x1], axis=-1)
    bw = jnp.stack([wy0 * wx0, wy0 * wx1, wy1 * wx0, wy1 * wx1], axis=-1)
    valid = (ys >= 0) & (ys <= h - 1) & (xs >= 0) & (xs <= w - 1)
    bw = bw * valid.astype(jnp.float32)                 # zero-padding OOB
    bw = bw * mask[..., None]                           # fold DCNv2 modulation
    yi = jnp.clip(ys, 0, h - 1).astype(jnp.int32)
    xi = jnp.clip(xs, 0, w - 1).astype(jnp.int32)
    # TODO(synk): data-dependent bilinear gather stays in plain JAX — TPU Pallas
    # has no efficient in-kernel gather for these indices.
    flat_idx = (yi * w + xi).reshape(b, -1)             # (B, H*W*9*4)
    x_flat = x_nhwc.reshape(b, h * w, c)
    gathered = jnp.take_along_axis(x_flat, flat_idx[..., None], axis=1)
    corners = gathered.reshape(b, h, w, 9, 4, c)
    samp = (corners * bw[..., None]).sum(axis=4)        # (B,H,W,9,C)
    return samp


# ---------------------------------------------------------------------------
# pallas_call wrappers
# ---------------------------------------------------------------------------
def _run_offset_mask(patches_flat, w_cat, b_cat):
    r, kdim = patches_flat.shape
    n_out = w_cat.shape[1]
    rp = pl.cdiv(r, TILE) * TILE
    pats = _pad_rows(patches_flat, rp)
    y = pl.pallas_call(
        _offset_mask_kernel,
        out_shape=jax.ShapeDtypeStruct((rp, n_out), jnp.float32),
        grid=(rp // TILE,),
        in_specs=[
            pl.BlockSpec((TILE, kdim), lambda i: (i, 0)),
            pl.BlockSpec((kdim, n_out), lambda i: (0, 0)),
            pl.BlockSpec((1, n_out), lambda i: (0, 0)),
        ],
        out_specs=pl.BlockSpec((TILE, n_out), lambda i: (i, 0)),
        compiler_params=pltpu.CompilerParams(dimension_semantics=("parallel",)),
    )(pats, w_cat, b_cat)
    return y[:r, :N_OFF], y[:r, N_OFF:]


def _run_deform(samp_flat, w2, bias):
    r, kdim = samp_flat.shape
    cout = w2.shape[1]
    rp = pl.cdiv(r, TILE) * TILE
    samp_p = _pad_rows(samp_flat, rp)
    out = pl.pallas_call(
        _deform_matmul_kernel,
        out_shape=jax.ShapeDtypeStruct((rp, cout), jnp.float32),
        grid=(rp // TILE,),
        in_specs=[
            pl.BlockSpec((TILE, kdim), lambda i: (i, 0)),
            pl.BlockSpec((kdim, cout), lambda i: (0, 0)),
            pl.BlockSpec((1, cout), lambda i: (0, 0)),
        ],
        out_specs=pl.BlockSpec((TILE, cout), lambda i: (i, 0)),
        compiler_params=pltpu.CompilerParams(dimension_semantics=("parallel",)),
    )(samp_p, w2, bias.reshape(1, cout))
    return out[:r]


# ---------------------------------------------------------------------------
# Module: parameters + forward
# ---------------------------------------------------------------------------
def init_params(key, in_channels, out_channels):
    # dilation != 0 path: DeformConv(out_channels, out_channels) -> x has
    # out_channels input channels.
    cin = out_channels
    k1, k2, k3, k4 = jax.random.split(key, 4)
    return {
        "p_conv_w": 0.1 * jax.random.normal(k1, (N_OFF, cin, 3, 3), jnp.float32),
        "p_conv_b": jnp.zeros((N_OFF,), jnp.float32),
        "m_conv_w": 0.1 * jax.random.normal(k2, (N_MSK, cin, 3, 3), jnp.float32),
        "m_conv_b": jnp.zeros((N_MSK,), jnp.float32),
        "dconv_w": jax.random.normal(k3, (out_channels, cin, 3, 3), jnp.float32)
                   / jnp.sqrt(9.0 * cin),
        "dconv_b": 0.01 * jax.random.normal(k4, (out_channels,), jnp.float32),
    }


def hallucination_module_forward(x_nchw, params, dilation):
    # TODO(synk): dilation==0 branch of the PyTorch module (zero offsets,
    # unpadded m_conv) is not wired up; this implements the dilation != 0
    # (DeformConv) path.
    assert dilation != 0
    b, c, h, w = x_nchw.shape
    cout = params["dconv_w"].shape[0]
    x_nhwc = jnp.transpose(x_nchw, (0, 2, 3, 1)).astype(jnp.float32)

    # --- fused p_conv + m_conv + sigmoid (Pallas kernel 1) ---
    patches = _extract_patches_nhwc(x_nhwc, dilation).reshape(b * h * w, c * 9)
    wp2 = params["p_conv_w"].reshape(N_OFF, c * 9).T
    wm2 = params["m_conv_w"].reshape(N_MSK, c * 9).T
    w_cat = jnp.concatenate([wp2, wm2], axis=1)                       # (c*9, 27)
    b_cat = jnp.concatenate([params["p_conv_b"], params["m_conv_b"]]
                            ).reshape(1, N_OFF + N_MSK)
    off_flat, mask_flat = _run_offset_mask(patches, w_cat, b_cat)
    offset = off_flat.reshape(b, h, w, N_OFF)
    mask = mask_flat.reshape(b, h, w, N_MSK)

    # --- bilinear sampling + mask folding (glue, fused into gather) ---
    samp = _deform_samples(x_nhwc, offset, mask).reshape(b * h * w, 9 * c)

    # --- modulated deformable conv as one lane-dense matmul (Pallas kernel 2)
    w2 = jnp.transpose(params["dconv_w"], (2, 3, 1, 0)).reshape(9 * c, cout)
    out_flat = _run_deform(samp, w2, params["dconv_b"])

    out_nchw = jnp.transpose(out_flat.reshape(b, h, w, cout), (0, 3, 1, 2))
    offset_nchw = jnp.transpose(offset, (0, 3, 1, 2))
    return out_nchw, offset_nchw


# ---------------------------------------------------------------------------
# Pure-JAX reference (same math, no Pallas) for correctness check
# ---------------------------------------------------------------------------
def _reference(x_nchw, params, dilation):
    b, c, h, w = x_nchw.shape
    cout = params["dconv_w"].shape[0]
    x_nhwc = jnp.transpose(x_nchw, (0, 2, 3, 1)).astype(jnp.float32)
    patches = _extract_patches_nhwc(x_nhwc, dilation).reshape(b * h * w, c * 9)
    wp2 = params["p_conv_w"].reshape(N_OFF, c * 9).T
    wm2 = params["m_conv_w"].reshape(N_MSK, c * 9).T
    off = (jnp.dot(patches, wp2, precision=lax.Precision.HIGHEST)
           + params["p_conv_b"])
    mask = jax.nn.sigmoid(jnp.dot(patches, wm2, precision=lax.Precision.HIGHEST)
                          + params["m_conv_b"])
    offset = off.reshape(b, h, w, N_OFF)
    samp = _deform_samples(x_nhwc, offset, mask.reshape(b, h, w, N_MSK))
    w2 = jnp.transpose(params["dconv_w"], (2, 3, 1, 0)).reshape(9 * c, cout)
    out = (jnp.dot(samp.reshape(b * h * w, 9 * c), w2,
                   precision=lax.Precision.HIGHEST) + params["dconv_b"])
    out = out.reshape(b, h, w, cout)
    return jnp.transpose(out, (0, 3, 1, 2)), jnp.transpose(offset, (0, 3, 1, 2))


if __name__ == "__main__":
    key = jax.random.PRNGKey(0)
    kx, kp = jax.random.split(key)
    B, C, H, W = 2, 4, 16, 16
    dilation = 2
    x = jax.random.normal(kx, (B, C, H, W), jnp.float32)
    params = init_params(kp, in_channels=C, out_channels=C)

    out, hall_map = hallucination_module_forward(x, params, dilation)
    out, hall_map = jax.block_until_ready((out, hall_map))

    ref_out, ref_map = _reference(x, params, dilation)
    assert out.shape == (B, C, H, W), out.shape
    assert hall_map.shape == (B, 18, H, W), hall_map.shape
    assert jnp.allclose(out, ref_out, atol=2e-3, rtol=2e-3)
    assert jnp.allclose(hall_map, ref_map, atol=2e-3, rtol=2e-3)
    print("KERNEL_OK")
</pallas_src>

<mosaic_0001>
module attributes {stable_mosaic.version = 11 : i64} {
  func.func @_offset_mask_kernel(%arg0: i32, %arg1: memref<512x36xf32, #tpu.memory_space<vmem>>, %arg2: memref<36x27xf32, #tpu.memory_space<vmem>>, %arg3: memref<1x27xf32, #tpu.memory_space<vmem>>, %arg4: memref<512x27xf32, #tpu.memory_space<vmem>>) attributes {dimension_semantics = [#tpu.dimension_semantics<parallel>], iteration_bounds = array<i64: 1>, scalar_prefetch = 0 : i64, scratch_operands = 0 : i64, tpu.core_type = #tpu.core_type<tc>, window_params = [{transform_indices = @transform_0, window_bounds = array<i64: 512, 36>}, {pipeline_mode = #tpu.pipeline_mode<synchronous>, transform_indices = @transform_1, window_bounds = array<i64: 36, 27>}, {pipeline_mode = #tpu.pipeline_mode<synchronous>, transform_indices = @transform_2, window_bounds = array<i64: 1, 27>}, {transform_indices = @transform_3, window_bounds = array<i64: 512, 27>}]} {
    %c0 = arith.constant 0 : index
    %c0_0 = arith.constant 0 : index
    %0 = vector.load %arg1[%c0, %c0_0] : memref<512x36xf32, #tpu.memory_space<vmem>>, vector<512x36xf32>
    %c0_1 = arith.constant 0 : index
    %c0_2 = arith.constant 0 : index
    %1 = vector.load %arg2[%c0_1, %c0_2] : memref<36x27xf32, #tpu.memory_space<vmem>>, vector<36x27xf32>
    %cst = arith.constant dense<0.000000e+00> : vector<512x27xf32>
    %2 = tpu.matmul %0, %1, %cst {dimension_numbers = #tpu.dot_dimension_numbers<[1], [0], [0], [1], [0, 0, 1, 1], [], []>} : vector<512x36xf32>, vector<36x27xf32>, vector<512x27xf32> -> vector<512x27xf32>
    %c0_3 = arith.constant 0 : index
    %c0_4 = arith.constant 0 : index
    %3 = vector.load %arg3[%c0_3, %c0_4] : memref<1x27xf32, #tpu.memory_space<vmem>>, vector<1x27xf32>
    %4 = vector.broadcast %3 : vector<1x27xf32> to vector<512x27xf32>
    %5 = arith.addf %2, %4 : vector<512x27xf32>
    %6 = tpu.iota {dimensions = array<i32: 1>} : vector<512x27xi32>
    %c18_i32 = arith.constant 18 : i32
    %7 = vector.broadcast %c18_i32 : i32 to vector<512x27xi32>
    %8 = arith.cmpi slt, %6, %7 : vector<512x27xi32>
    %9 = arith.negf %5 : vector<512x27xf32>
    %10 = math.exp %9 : vector<512x27xf32>
    %cst_5 = arith.constant 1.000000e+00 : f32
    %11 = vector.broadcast %cst_5 : f32 to vector<512x27xf32>
    %12 = arith.addf %11, %10 : vector<512x27xf32>
    %13 = arith.divf %11, %12 : vector<512x27xf32>
    %14 = arith.select %8, %5, %13 : vector<512x27xi1>, vector<512x27xf32>
    %c0_6 = arith.constant 0 : index
    %c0_7 = arith.constant 0 : index
    %15 = vector.load %arg4[%c0_6, %c0_7] : memref<512x27xf32, #tpu.memory_space<vmem>>, vector<512x27xf32>
    tpu.vector_store %arg4[%c0_6, %c0_7], %14 {strides = array<i32>} : memref<512x27xf32, #tpu.memory_space<vmem>>, vector<512x27xf32>,
    return
  }
  func.func @transform_0(%arg0: i32) -> (i32, i32) {
    %c0_i32 = arith.constant 0 : i32
    %c0_i32_0 = arith.constant 0 : i32
    return %arg0, %c0_i32 : i32, i32
  }
  func.func @transform_1(%arg0: i32) -> (i32, i32) {
    %c0_i32 = arith.constant 0 : i32
    %c0_i32_0 = arith.constant 0 : i32
    %c0_i32_1 = arith.constant 0 : i32
    return %c0_i32, %c0_i32_0 : i32, i32
  }
  func.func @transform_2(%arg0: i32) -> (i32, i32) {
    %c0_i32 = arith.constant 0 : i32
    %c0_i32_0 = arith.constant 0 : i32
    %c0_i32_1 = arith.constant 0 : i32
    return %c0_i32, %c0_i32_0 : i32, i32
  }
  func.func @transform_3(%arg0: i32) -> (i32, i32) {
    %c0_i32 = arith.constant 0 : i32
    %c0_i32_0 = arith.constant 0 : i32
    return %arg0, %c0_i32 : i32, i32
  }
}

</mosaic_0001>

<bundles_post_ra>
// kernel: tpu_custom_call.1
= control target key start
LH: loop header
LB: loop body
LE: loop exit
PB: predicated region body
PF: predicated region fallthrough
CT: control target
= control target key end

     0   :  { %vm283_vm0 = vcmask 1043456   ;;  %vm90_vm1 = vcmask 293888   ;;  %vm1123_vm3 = vcmask 220160   ;;  %s2780_s1 = inlined_call_operand.vmem [shape: f32[36,27], index: 1, kind: input, shape index: {}]   ;;  %s2781_s0 = inlined_call_operand.vmem [shape: f32[512,36], index: 0, kind: input, shape index: {}]   ;;  %s2782_s2 = inlined_call_operand.vmem [shape: f32[1,27], index: 2, kind: input, shape index: {}]   ;;  %s2783_s3 = inlined_call_operand.vmem [shape: f32[512,27], index: 3, kind: output, shape index: {}]  }
   0x1   :  { %v82_v0 = vld [vmem:[%s2780_s1 + $0x20] sm:$0xf]  ;;  %v81_v1 = vld [vmem:[%s2780_s1 + $0x18] sm:$0xff]  ;;  %v80_v2 = vld [vmem:[%s2780_s1 + $0x10] sm:$0xff] }
   0x2   :  { %1391 = vmatprep.subr.msk.mxu0 %vm283_vm0, %v82_v0  ;;  %1497 = vmatprep.subr.msk.mxu1 %vm283_vm0, %v82_v0  ;;  %v79_v3 = vld [vmem:[%s2780_s1 + $0x8] sm:$0xff]  ;;  %v78_v4 = vld [vmem:[%s2780_s1] sm:$0xff]  ;;  %v16_v9 = vld [vmem:[%s2781_s0 + $0x10] sm:$0xff] }
   0x3   :  { %1392 = vmatpush3.msk.msra.mxu0 %vm283_vm0, %v82_v0  ;;  %1502 = vmatpush3.msk.msra.mxu1 %vm283_vm0, %v82_v0  ;;  %v14_v5 = vld [vmem:[%s2781_s0] sm:$0xff]  ;;  %v15_v7 = vld [vmem:[%s2781_s0 + $0x8] sm:$0xff]  ;;  %v48_v10 = vld [vmem:[%s2781_s0 + $0x110] sm:$0xff] }
   0x4   :  { %1393 = vmatprep.subr.mxu0 %v81_v1  ;;  %1498 = vmatprep.subr.mxu1 %v81_v1  ;;  %v46_v6 = vld [vmem:[%s2781_s0 + $0x100] sm:$0xff]  ;;  %v47_v8 = vld [vmem:[%s2781_s0 + $0x108] sm:$0xff]  ;;  %v17_v11 = vld [vmem:[%s2781_s0 + $0x18] sm:$0xff] }
   0x5   :  { %1394 = vmatpush3.msra.mxu0 %v81_v1  ;;  %1503 = vmatpush3.msra.mxu1 %v81_v1  ;;  %v49_v12 = vld [vmem:[%s2781_s0 + $0x118] sm:$0xff]  ;;  %v18_v13 = vld [vmem:[%s2781_s0 + $0x20] sm:$0xff]  ;;  %v19_v15 = vld [vmem:[%s2781_s0 + $0x28] sm:$0xff] }
   0x6   :  { %1395 = vmatprep.subr.mxu0 %v80_v2  ;;  %1499 = vmatprep.subr.mxu1 %v80_v2  ;;  %v50_v14 = vld [vmem:[%s2781_s0 + $0x120] sm:$0xff]  ;;  %v51_v16 = vld [vmem:[%s2781_s0 + $0x128] sm:$0xff]  ;;  %v20_v17 = vld [vmem:[%s2781_s0 + $0x30] sm:$0xff] }
   0x7   :  { %1396 = vmatpush3.msra.mxu0 %v80_v2  ;;  %1504 = vmatpush3.msra.mxu1 %v80_v2  ;;  %v52_v18 = vld [vmem:[%s2781_s0 + $0x130] sm:$0xff]  ;;  %v21_v19 = vld [vmem:[%s2781_s0 + $0x38] sm:$0xff]  ;;  %v22_v21 = vld [vmem:[%s2781_s0 + $0x40] sm:$0xff] }
   0x8   :  { %1397 = vmatprep.subr.mxu0 %v79_v3  ;;  %1500 = vmatprep.subr.mxu1 %v79_v3  ;;  %v53_v20 = vld [vmem:[%s2781_s0 + $0x138] sm:$0xff]  ;;  %v54_v22 = vld [vmem:[%s2781_s0 + $0x140] sm:$0xff]  ;;  %v23_v23 = vld [vmem:[%s2781_s0 + $0x48] sm:$0xff] }
   0x9   :  { %1398 = vmatpush3.msra.mxu0 %v79_v3  ;;  %1505 = vmatpush3.msra.mxu1 %v79_v3  ;;  %v55_v24 = vld [vmem:[%s2781_s0 + $0x148] sm:$0xff]  ;;  %v24_v25 = vld [vmem:[%s2781_s0 + $0x50] sm:$0xff]  ;;  %v25_v27 = vld [vmem:[%s2781_s0 + $0x58] sm:$0xff] }
   0xa   :  { %1399 = vmatprep.subr.mxu0 %v78_v4  ;;  %1501 = vmatprep.subr.mxu1 %v78_v4  ;;  %v56_v26 = vld [vmem:[%s2781_s0 + $0x150] sm:$0xff]  ;;  %v57_v28 = vld [vmem:[%s2781_s0 + $0x158] sm:$0xff]  ;;  %v26_v29 = vld [vmem:[%s2781_s0 + $0x60] sm:$0xff] }
   0xb   :  { %1400 = vmatpush3.msra.mxu0 %v78_v4  ;;  %1506 = vmatpush3.msra.mxu1 %v78_v4  ;;  %v58_v30 = vld [vmem:[%s2781_s0 + $0x160] sm:$0xff]  ;;  %v27_v31 = vld [vmem:[%s2781_s0 + $0x68] sm:$0xff]  ;;  %v28_v33 = vld [vmem:[%s2781_s0 + $0x70] sm:$0xff] }
   0xc   :  { %1401 = vmatprep.mubr.msk.f32.mxu0 %vm90_vm1, %v14_v5  ;;  %1449 = vmatprep.mubr.msk.f32.mxu1 %vm90_vm1, %v46_v6  ;;  %v59_v32 = vld [vmem:[%s2781_s0 + $0x168] sm:$0xff]  ;;  %v60_v34 = vld [vmem:[%s2781_s0 + $0x170] sm:$0xff]  ;;  %v29_v35 = vld [vmem:[%s2781_s0 + $0x78] sm:$0xff] }
   0xd   :  { %1402 = vmatmul.mubr.msk.f32.vlgmr.msra.gmra.mxu0 %vm90_vm1, %v15_v7  ;;  %1450 = vmatmul.mubr.msk.f32.vlgmr.msra.gmra.mxu1 %vm90_vm1, %v47_v8  ;;  %v61_v36 = vld [vmem:[%s2781_s0 + $0x178] sm:$0xff]  ;;  %v30_v37 = vld [vmem:[%s2781_s0 + $0x80] sm:$0xff]  ;;  %v31_v39 = vld [vmem:[%s2781_s0 + $0x88] sm:$0xff] }
   0xe   :  { %1404 = vmatprep.mubr.msk.f32.mxu0 %vm90_vm1, %v16_v9  ;;  %1452 = vmatprep.mubr.msk.f32.mxu1 %vm90_vm1, %v48_v10  ;;  %v62_v38 = vld [vmem:[%s2781_s0 + $0x180] sm:$0xff]  ;;  %v63_v40 = vld [vmem:[%s2781_s0 + $0x188] sm:$0xff]  ;;  %v32_v41 = vld [vmem:[%s2781_s0 + $0x90] sm:$0xff] }
   0xf   :  { %v64_v42 = vld [vmem:[%s2781_s0 + $0x190] sm:$0xff]  ;;  %v33_v43 = vld [vmem:[%s2781_s0 + $0x98] sm:$0xff]  ;;  %v34_v45 = vld [vmem:[%s2781_s0 + $0xa0] sm:$0xff] }
  0x10   :  { %v65_v44 = vld [vmem:[%s2781_s0 + $0x198] sm:$0xff]  ;;  %v66_v46 = vld [vmem:[%s2781_s0 + $0x1a0] sm:$0xff]  ;;  %v35_v47 = vld [vmem:[%s2781_s0 + $0xa8] sm:$0xff] }
  0x11   :  { %1405 = vmatmul.mubr.msk.f32.gmra.mxu0 %vm90_vm1, %v17_v11  ;;  %1453 = vmatmul.mubr.msk.f32.gmra.mxu1 %vm90_vm1, %v49_v12  ;;  %v67_v48 = vld [vmem:[%s2781_s0 + $0x1a8] sm:$0xff]  ;;  %v36_v49 = vld [vmem:[%s2781_s0 + $0xb0] sm:$0xff]  ;;  %v37_v51 = vld [vmem:[%s2781_s0 + $0xb8] sm:$0xff] }
  0x12   :  { %1407 = vmatprep.mubr.msk.f32.mxu0 %vm90_vm1, %v18_v13  ;;  %1455 = vmatprep.mubr.msk.f32.mxu1 %vm90_vm1, %v50_v14  ;;  %v68_v50 = vld [vmem:[%s2781_s0 + $0x1b0] sm:$0xff]  ;;  %v69_v52 = vld [vmem:[%s2781_s0 + $0x1b8] sm:$0xff]  ;;  %v38_v53 = vld [vmem:[%s2781_s0 + $0xc0] sm:$0xff] }
  0x13   :  { %v70_v54 = vld [vmem:[%s2781_s0 + $0x1c0] sm:$0xff]  ;;  %v39_v55 = vld [vmem:[%s2781_s0 + $0xc8] sm:$0xff]  ;;  %v40_v57 = vld [vmem:[%s2781_s0 + $0xd0] sm:$0xff] }
  0x14   :  { %v71_v56 = vld [vmem:[%s2781_s0 + $0x1c8] sm:$0xff]  ;;  %v72_v58 = vld [vmem:[%s2781_s0 + $0x1d0] sm:$0xff]  ;;  %v41_v59 = vld [vmem:[%s2781_s0 + $0xd8] sm:$0xff] }
  0x15   :  { %1408 = vmatmul.mubr.msk.f32.gmra.mxu0 %vm90_vm1, %v19_v15  ;;  %1456 = vmatmul.mubr.msk.f32.gmra.mxu1 %vm90_vm1, %v51_v16  ;;  %v73_v60 = vld [vmem:[%s2781_s0 + $0x1d8] sm:$0xff]  ;;  %v42_v61 = vld [vmem:[%s2781_s0 + $0xe0] sm:$0xff]  ;;  %v43_v63 = vld [vmem:[%s2781_s0 + $0xe8] sm:$0xff] }
  0x16   :  { %1410 = vmatprep.mubr.msk.f32.mxu0 %vm90_vm1, %v20_v17  ;;  %1458 = vmatprep.mubr.msk.f32.mxu1 %vm90_vm1, %v52_v18  ;;  %v74_v62 = vld [vmem:[%s2781_s0 + $0x1e0] sm:$0xff]  ;;  %v75_v0 = vld [vmem:[%s2781_s0 + $0x1e8] sm:$0xff]  ;;  %v44_v1 = vld [vmem:[%s2781_s0 + $0xf0] sm:$0xff] }
  0x17   :  { %v76_v2 = vld [vmem:[%s2781_s0 + $0x1f0] sm:$0xff]  ;;  %v45_v3 = vld [vmem:[%s2781_s0 + $0xf8] sm:$0xff]  ;;  %v2058_v5 = vld [vmem:[%s2782_s2] ss:$0 sm:$0xff] }
  0x18   :  { %v77_v4 = vld [vmem:[%s2781_s0 + $0x1f8] sm:$0xff] }
  0x19   :  { %1411 = vmatmul.mubr.msk.f32.gmra.mxu0 %vm90_vm1, %v21_v19  ;;  %1459 = vmatmul.mubr.msk.f32.gmra.mxu1 %vm90_vm1, %v53_v20 }
  0x1a   :  { %1413 = vmatprep.mubr.msk.f32.mxu0 %vm90_vm1, %v22_v21  ;;  %1461 = vmatprep.mubr.msk.f32.mxu1 %vm90_vm1, %v54_v22 }
  0x1d   :  { %1414 = vmatmul.mubr.msk.f32.gmra.mxu0 %vm90_vm1, %v23_v23  ;;  %1462 = vmatmul.mubr.msk.f32.gmra.mxu1 %vm90_vm1, %v55_v24 }
  0x1e   :  { %1416 = vmatprep.mubr.msk.f32.mxu0 %vm90_vm1, %v24_v25  ;;  %1464 = vmatprep.mubr.msk.f32.mxu1 %vm90_vm1, %v56_v26 }
  0x21   :  { %1417 = vmatmul.mubr.msk.f32.gmra.mxu0 %vm90_vm1, %v25_v27  ;;  %1465 = vmatmul.mubr.msk.f32.gmra.mxu1 %vm90_vm1, %v57_v28 }
  0x22   :  { %1419 = vmatprep.mubr.msk.f32.mxu0 %vm90_vm1, %v26_v29  ;;  %1467 = vmatprep.mubr.msk.f32.mxu1 %vm90_vm1, %v58_v30 }
  0x25   :  { %1420 = vmatmul.mubr.msk.f32.gmra.mxu0 %vm90_vm1, %v27_v31  ;;  %1468 = vmatmul.mubr.msk.f32.gmra.mxu1 %vm90_vm1, %v59_v32 }
  0x26   :  { %1422 = vmatprep.mubr.msk.f32.mxu0 %vm90_vm1, %v28_v33  ;;  %1470 = vmatprep.mubr.msk.f32.mxu1 %vm90_vm1, %v60_v34 }
  0x29   :  { %1423 = vmatmul.mubr.msk.f32.gmra.mxu0 %vm90_vm1, %v29_v35  ;;  %1471 = vmatmul.mubr.msk.f32.gmra.mxu1 %vm90_vm1, %v61_v36 }
  0x2a   :  { %1425 = vmatprep.mubr.msk.f32.mxu0 %vm90_vm1, %v30_v37  ;;  %1473 = vmatprep.mubr.msk.f32.mxu1 %vm90_vm1, %v62_v38 }
  0x2d   :  { %1426 = vmatmul.mubr.msk.f32.gmra.mxu0 %vm90_vm1, %v31_v39  ;;  %1474 = vmatmul.mubr.msk.f32.gmra.mxu1 %vm90_vm1, %v63_v40 }
  0x2e   :  { %1428 = vmatprep.mubr.msk.f32.mxu0 %vm90_vm1, %v32_v41  ;;  %1476 = vmatprep.mubr.msk.f32.mxu1 %vm90_vm1, %v64_v42 }
  0x31   :  { %1429 = vmatmul.mubr.msk.f32.gmra.mxu0 %vm90_vm1, %v33_v43  ;;  %1477 = vmatmul.mubr.msk.f32.gmra.mxu1 %vm90_vm1, %v65_v44 }
  0x32   :  { %1431 = vmatprep.mubr.msk.f32.mxu0 %vm90_vm1, %v34_v45  ;;  %1479 = vmatprep.mubr.msk.f32.mxu1 %vm90_vm1, %v66_v46 }
  0x35   :  { %1432 = vmatmul.mubr.msk.f32.gmra.mxu0 %vm90_vm1, %v35_v47  ;;  %1480 = vmatmul.mubr.msk.f32.gmra.mxu1 %vm90_vm1, %v67_v48 }
  0x36   :  { %1434 = vmatprep.mubr.msk.f32.mxu0 %vm90_vm1, %v36_v49  ;;  %1482 = vmatprep.mubr.msk.f32.mxu1 %vm90_vm1, %v68_v50 }
  0x39   :  { %1435 = vmatmul.mubr.msk.f32.gmra.mxu0 %vm90_vm1, %v37_v51  ;;  %1483 = vmatmul.mubr.msk.f32.gmra.mxu1 %vm90_vm1, %v69_v52 }
  0x3a   :  { %1437 = vmatprep.mubr.msk.f32.mxu0 %vm90_vm1, %v38_v53  ;;  %1485 = vmatprep.mubr.msk.f32.mxu1 %vm90_vm1, %v70_v54 }
  0x3d   :  { %1438 = vmatmul.mubr.msk.f32.gmra.mxu0 %vm90_vm1, %v39_v55  ;;  %1486 = vmatmul.mubr.msk.f32.gmra.mxu1 %vm90_vm1, %v71_v56 }
  0x3e   :  { %1440 = vmatprep.mubr.msk.f32.mxu0 %vm90_vm1, %v40_v57  ;;  %1488 = vmatprep.mubr.msk.f32.mxu1 %vm90_vm1, %v72_v58 }
  0x41   :  { %1441 = vmatmul.mubr.msk.f32.gmra.mxu0 %vm90_vm1, %v41_v59  ;;  %1489 = vmatmul.mubr.msk.f32.gmra.mxu1 %vm90_vm1, %v73_v60 }
  0x42   :  { %1443 = vmatprep.mubr.msk.f32.mxu0 %vm90_vm1, %v42_v61  ;;  %1491 = vmatprep.mubr.msk.f32.mxu1 %vm90_vm1, %v74_v62 }
  0x45   :  { %1444 = vmatmul.mubr.msk.f32.gmra.mxu0 %vm90_vm1, %v43_v63  ;;  %1492 = vmatmul.mubr.msk.f32.gmra.mxu1 %vm90_vm1, %v75_v0 }
  0x46   :  { %1446 = vmatprep.mubr.msk.f32.mxu0 %vm90_vm1, %v44_v1  ;;  %1494 = vmatprep.mubr.msk.f32.mxu1 %vm90_vm1, %v76_v2 }
  0x49   :  { %1447 = vmatmul.mubr.msk.f32.gmra.mxu0 %vm90_vm1, %v45_v3  ;;  %1495 = vmatmul.mubr.msk.f32.gmra.mxu1 %vm90_vm1, %v77_v4 }
  0xcd   :  { %v1403_v6 = vpop.f32.mrf.mxu0  ;;  %v1451_v7 = vpop.f32.mrf.mxu1 }
  0xce   :  { %v2061_v8 = vadd.f32 %v1403_v6, %v2058_v5  ;;  %v2064_v9 = vadd.f32 %v1451_v7, %v2058_v5  ;;  %v672_v7 = vlaneseq }
  0xcf   :  { %v353_v10 = vpop.f32.mrf.mxu0  ;;  %v513_v11 = vpop.f32.mrf.mxu1 }
  0xd0   :  { %v1259_v12 = vmul.f32 -1.442695, %v2061_v8  ;;  %v1291_v13 = vmul.f32 -1.442695, %v2064_v9  ;;  %v2069_v14 = vadd.f32 %v2058_v5, %v353_v10  ;;  %v2072_v15 = vadd.f32 %v2058_v5, %v513_v11 }
  0xd1   :  { %v1406_v16 = vpop.f32.mrf.mxu0  ;;  %v1454_v17 = vpop.f32.mrf.mxu1 }
  0xd2   :  { %1507 = vpow2.f32 %v1259_v12  ;;  %v1258_v18 = vmul.f32 -1.442695, %v2069_v14  ;;  %v1290_v19 = vmul.f32 -1.442695, %v2072_v15  ;;  %v2077_v20 = vadd.f32 %v1406_v16, %v2058_v5 }
  0xd3   :  { %1509 = vpow2.f32 %v1291_v13  ;;  %v2080_v21 = vadd.f32 %v1454_v17, %v2058_v5  ;;  %v363_v22 = vpop.f32.mrf.mxu0  ;;  %v523_v23 = vpop.f32.mrf.mxu1 }
  0xd4   :  { %1511 = vpow2.f32 %v1258_v18  ;;  %v1261_v24 = vmul.f32 -1.442695, %v2077_v20  ;;  %v2084_v25 = vadd.f32 %v2058_v5, %v363_v22  ;;  %v2087_v26 = vadd.f32 %v2058_v5, %v523_v23 }
  0xd5   :  { %1513 = vpow2.f32 %v1290_v19  ;;  %v1293_v27 = vmul.f32 -1.442695, %v2080_v21  ;;  %v1409_v28 = vpop.f32.mrf.mxu0  ;;  %v1457_v29 = vpop.f32.mrf.mxu1 }
  0xd6   :  { %1515 = vpow2.f32 %v1261_v24  ;;  %v1260_v30 = vmul.f32 -1.442695, %v2084_v25  ;;  %v1292_v31 = vmul.f32 -1.442695, %v2087_v26  ;;  %v2093_v32 = vadd.f32 %v1409_v28, %v2058_v5 }
  0xd7   :  { %1517 = vpow2.f32 %v1293_v27  ;;  %v2096_v33 = vadd.f32 %v1457_v29, %v2058_v5  ;;  %v373_v34 = vpop.f32.mrf.mxu0  ;;  %v533_v35 = vpop.f32.mrf.mxu1  ;;  %v2124_v24 = vand.u32 127, %v672_v7 }
  0xd8   :  { %1519 = vpow2.f32 %v1260_v30  ;;  %v1263_v36 = vmul.f32 -1.442695, %v2093_v32  ;;  %v2100_v37 = vadd.f32 %v2058_v5, %v373_v34  ;;  %v2103_v38 = vadd.f32 %v2058_v5, %v533_v35 }
  0xd9   :  { %1521 = vpow2.f32 %v1292_v31  ;;  %v1295_v39 = vmul.f32 -1.442695, %v2096_v33  ;;  %v1412_v40 = vpop.f32.mrf.mxu0  ;;  %v1460_v41 = vpop.f32.mrf.mxu1  ;;  %vm674_vm2 = vcmp.lt.s32.totalorder %v2124_v24, 18 }
  0xda   :  { %1523 = vpow2.f32 %v1263_v36  ;;  %v1262_v42 = vmul.f32 -1.442695, %v2100_v37  ;;  %v1294_v43 = vmul.f32 -1.442695, %v2103_v38  ;;  %v2109_v44 = vadd.f32 %v1412_v40, %v2058_v5 }
  0xdb   :  { %1525 = vpow2.f32 %v1295_v39  ;;  %v2112_v45 = vadd.f32 %v1460_v41, %v2058_v5  ;;  %v383_v46 = vpop.f32.mrf.mxu0  ;;  %v543_v47 = vpop.f32.mrf.mxu1 }
  0xdc   :  { %1527 = vpow2.f32 %v1262_v42  ;;  %v1265_v48 = vmul.f32 -1.442695, %v2109_v44  ;;  %v2116_v49 = vadd.f32 %v2058_v5, %v383_v46  ;;  %v2119_v50 = vadd.f32 %v2058_v5, %v543_v47 }
  0xdd   :  { %1529 = vpow2.f32 %v1294_v43  ;;  %v1297_v51 = vmul.f32 -1.442695, %v2112_v45  ;;  %v1415_v52 = vpop.f32.mrf.mxu0  ;;  %v1463_v53 = vpop.f32.mrf.mxu1 }
  0xde   :  { %1531 = vpow2.f32 %v1265_v48  ;;  %v1264_v54 = vmul.f32 -1.442695, %v2116_v49  ;;  %v1296_v55 = vmul.f32 -1.442695, %v2119_v50  ;;  %v2127_v35 = vadd.f32 %v1415_v52, %v2058_v5 }
  0xdf   :  { %v1508_v56 = vpop.eup %1507  ;;  %1533 = vpow2.f32 %v1297_v51  ;;  %v393_v57 = vpop.f32.mrf.mxu0  ;;  %v2130_v41 = vadd.f32 %v1463_v53, %v2058_v5 }
  0xe0   :  { %v553_v58 = vpop.f32.mrf.mxu1  ;;  %v1510_v59 = vpop.eup %1509  ;;  %v868_v60 = vadd.f32 1.0, %v1508_v56  ;;  %1535 = vpow2.f32 %v1264_v54  ;;  %v2134_v46 = vadd.f32 %v2058_v5, %v393_v57 }
  0xe1   :  { %v1512_v61 = vpop.eup %1511  ;;  %v900_v62 = vadd.f32 1.0, %v1510_v59  ;;  %1537 = vpow2.f32 %v1296_v55  ;;  %v1418_v63 = vpop.f32.mrf.mxu0  ;;  %v2137_v51 = vadd.f32 %v2058_v5, %v553_v58  ;;  %v1267_v55 = vmul.f32 -1.442695, %v2127_v35 }
  0xe2   :  { %v1514_v0 = vpop.eup %1513  ;;  %1539 = vrcp.f32 %v868_v60  ;;  %v867_v1 = vadd.f32 1.0, %v1512_v61  ;;  %v1466_v2 = vpop.f32.mrf.mxu1  ;;  %v2141_v56 = vadd.f32 %v1418_v63, %v2058_v5  ;;  %v1299_v61 = vmul.f32 -1.442695, %v2130_v41 }
  0xe3   :  { %v1516_v3 = vpop.eup %1515  ;;  %1541 = vrcp.f32 %v900_v62  ;;  %v899_v4 = vadd.f32 1.0, %v1514_v0  ;;  %v403_v13 = vpop.f32.mrf.mxu0  ;;  %v2145_v62 = vadd.f32 %v1466_v2, %v2058_v5 }
  0xe4   :  { %v1518_v6 = vpop.eup %1517  ;;  %1543 = vrcp.f32 %v867_v1  ;;  %v870_v10 = vadd.f32 1.0, %v1516_v3  ;;  %v563_v18 = vpop.f32.mrf.mxu1  ;;  %v1266_v1 = vmul.f32 -1.442695, %v2134_v46  ;;  %v2152_v63 = vadd.f32 %v2058_v5, %v403_v13 }
  0xe5   :  { %v1520_v11 = vpop.eup %1519  ;;  %1545 = vrcp.f32 %v899_v4  ;;  %v902_v12 = vadd.f32 1.0, %v1518_v6  ;;  %v1421_v30 = vpop.f32.mrf.mxu0  ;;  %v1298_v4 = vmul.f32 -1.442695, %v2137_v51 }
  0xe6   :  { %v1522_v16 = vpop.eup %1521  ;;  %1547 = vrcp.f32 %v870_v10  ;;  %v869_v17 = vadd.f32 1.0, %v1520_v11  ;;  %v1469_v36 = vpop.f32.mrf.mxu1  ;;  %v2174_v11 = vadd.f32 %v1421_v30, %v2058_v5 }
  0xe7   :  { %v1524_v19 = vpop.eup %1523  ;;  %1549 = vrcp.f32 %v902_v12  ;;  %v901_v22 = vadd.f32 1.0, %v1522_v16  ;;  %v413_v52 = vpop.f32.mrf.mxu0 }
  0xe8   :  { %v1526_v23 = vpop.eup %1525  ;;  %1551 = vrcp.f32 %v869_v17  ;;  %v872_v27 = vadd.f32 1.0, %v1524_v19  ;;  %v573_v59 = vpop.f32.mrf.mxu1  ;;  %v2185_v17 = vadd.f32 %v1469_v36, %v2058_v5 }
  0xe9   :  { %v1528_v28 = vpop.eup %1527  ;;  %1553 = vrcp.f32 %v901_v22  ;;  %v904_v29 = vadd.f32 1.0, %v1526_v23  ;;  %v1424_v6 = vpop.f32.mrf.mxu0  ;;  %v1268_v22 = vmul.f32 -1.442695, %v2152_v63 }
  0xea   :  { %v1530_v31 = vpop.eup %1529  ;;  %1555 = vrcp.f32 %v872_v27  ;;  %v871_v34 = vadd.f32 1.0, %v1528_v28  ;;  %v1472_v12 = vpop.f32.mrf.mxu1 }
  0xeb   :  { %v1532_v39 = vpop.eup %1531  ;;  %1557 = vrcp.f32 %v904_v29  ;;  %v903_v40 = vadd.f32 1.0, %v1530_v31  ;;  %v423_v29 = vpop.f32.mrf.mxu0 }
  0xec   :  { %v1534_v42 = vpop.eup %1533  ;;  %1559 = vrcp.f32 %v871_v34  ;;  %v874_v43 = vadd.f32 1.0, %v1532_v39  ;;  %v2218_v34 = vadd.f32 %v1424_v6, %v2058_v5  ;;  %v583_v36 = vpop.f32.mrf.mxu1 }
  0xed   :  { %v1536_v47 = vpop.eup %1535  ;;  %1561 = vrcp.f32 %v903_v40  ;;  %v906_v48 = vadd.f32 1.0, %v1534_v42  ;;  %v2229_v42 = vadd.f32 %v1472_v12, %v2058_v5 }
  0xee   :  { %v1538_v54 = vpop.eup %1537  ;;  %1563 = vrcp.f32 %v874_v43  ;;  %v873_v53 = vadd.f32 1.0, %v1536_v47 }
  0xef   :  { %v1540_v60 = vpop.eup %1539  ;;  %1565 = vrcp.f32 %v906_v48  ;;  %v905_v57 = vadd.f32 1.0, %v1538_v54 }
  0xf0   :  { %v1542_v58 = vpop.eup %1541  ;;  %v1060_v0 = vsel %vm674_vm2, %v2061_v8, %v1540_v60  ;;  %1567 = vrcp.f32 %v873_v53  ;;  %v2163_v8 = vadd.f32 %v2058_v5, %v563_v18 }
  0xf1   :  { %v1544_v3 = vpop.eup %1543  ;;  %1125 = vst.msk [vmem:[%s2783_s3 + $0x8] sm:$0xff] %vm1123_vm3, %v1060_v0  ;;  %v1092_v2 = vsel %vm674_vm2, %v2064_v9, %v1542_v58  ;;  %1569 = vrcp.f32 %v905_v57  ;;  %v1269_v9 = vmul.f32 -1.442695, %v2141_v56  ;;  %v2263_v57 = vpop.f32.mrf.mxu1  ;;  %v1305_v0 = vmul.f32 -1.442695, %v2229_v42 }
  0xf2   :  { %v1546_v7 = vpop.eup %1545  ;;  %1157 = vst.msk [vmem:[%s2783_s3 + $0x108] sm:$0xff] %vm1123_vm3, %v1092_v2  ;;  %v1059_v10 = vsel %vm674_vm2, %v2069_v14, %v1544_v3  ;;  %1571 = vpow2.f32 %v1267_v55  ;;  %v1301_v14 = vmul.f32 -1.442695, %v2145_v62  ;;  %v1300_v28 = vmul.f32 -1.442695, %v2163_v8  ;;  %v2253_v55 = vpop.f32.mrf.mxu0 }
  0xf3   :  { %v1548_v13 = vpop.eup %1547  ;;  %1124 = vst.msk [vmem:[%s2783_s3] sm:$0xff] %vm1123_vm3, %v1059_v10  ;;  %v1091_v16 = vsel %vm674_vm2, %v2072_v15, %v1546_v7  ;;  %1573 = vpow2.f32 %v1299_v61  ;;  %v2196_v15 = vadd.f32 %v2058_v5, %v413_v52  ;;  %v593_v10 = vpop.f32.mrf.mxu1 }
  0xf4   :  { %v1550_v18 = vpop.eup %1549  ;;  %1156 = vst.msk [vmem:[%s2783_s3 + $0x100] sm:$0xff] %vm1123_vm3, %v1091_v16  ;;  %v1062_v19 = vsel %vm674_vm2, %v2077_v20, %v1548_v13  ;;  %1575 = vpow2.f32 %v1266_v1  ;;  %v2207_v20 = vadd.f32 %v2058_v5, %v573_v59  ;;  %v433_v6 = vpop.f32.mrf.mxu0 }
  0xf5   :  { %v1552_v23 = vpop.eup %1551  ;;  %1127 = vst.msk [vmem:[%s2783_s3 + $0x18] sm:$0xff] %vm1123_vm3, %v1062_v19  ;;  %v1094_v27 = vsel %vm674_vm2, %v2080_v21, %v1550_v18  ;;  %1577 = vpow2.f32 %v1298_v4  ;;  %v1271_v21 = vmul.f32 -1.442695, %v2174_v11  ;;  %v1270_v48 = vmul.f32 -1.442695, %v2196_v15 }
  0xf6   :  { %v1554_v30 = vpop.eup %1553  ;;  %1159 = vst.msk [vmem:[%s2783_s3 + $0x118] sm:$0xff] %vm1123_vm3, %v1094_v27  ;;  %v1061_v31 = vsel %vm674_vm2, %v2084_v25, %v1552_v23  ;;  %1579 = vpow2.f32 %v1269_v9  ;;  %v1303_v25 = vmul.f32 -1.442695, %v2185_v17  ;;  %v1302_v53 = vmul.f32 -1.442695, %v2207_v20 }
  0xf7   :  { %v1556_v39 = vpop.eup %1555  ;;  %1126 = vst.msk [vmem:[%s2783_s3 + $0x10] sm:$0xff] %vm1123_vm3, %v1061_v31  ;;  %v1093_v40 = vsel %vm674_vm2, %v2087_v26, %v1554_v30  ;;  %1581 = vpow2.f32 %v1301_v14  ;;  %v2240_v26 = vadd.f32 %v2058_v5, %v423_v29  ;;  %v1430_v14 = vpop.f32.mrf.mxu0 }
  0xf8   :  { %v1558_v43 = vpop.eup %1557  ;;  %1158 = vst.msk [vmem:[%s2783_s3 + $0x110] sm:$0xff] %vm1123_vm3, %v1093_v40  ;;  %v1064_v47 = vsel %vm674_vm2, %v2093_v32, %v1556_v39  ;;  %1583 = vpow2.f32 %v1268_v22  ;;  %v2251_v32 = vadd.f32 %v2058_v5, %v583_v36  ;;  %v1478_v22 = vpop.f32.mrf.mxu1 }
  0xf9   :  { %v1560_v52 = vpop.eup %1559  ;;  %1129 = vst.msk [vmem:[%s2783_s3 + $0x28] sm:$0xff] %vm1123_vm3, %v1064_v47  ;;  %v1096_v54 = vsel %vm674_vm2, %v2096_v33, %v1558_v43  ;;  %1585 = vpow2.f32 %v1300_v28  ;;  %v1273_v33 = vmul.f32 -1.442695, %v2218_v34  ;;  %v1272_v3 = vmul.f32 -1.442695, %v2240_v26  ;;  %v443_v31 = vpop.f32.mrf.mxu0 }
  0xfa   :  { %v1562_v59 = vpop.eup %1561  ;;  %1161 = vst.msk [vmem:[%s2783_s3 + $0x128] sm:$0xff] %vm1123_vm3, %v1096_v54  ;;  %v1063_v60 = vsel %vm674_vm2, %v2100_v37, %v1560_v52  ;;  %1587 = vpow2.f32 %v1271_v21  ;;  %v1304_v4 = vmul.f32 -1.442695, %v2251_v32  ;;  %v603_v39 = vpop.f32.mrf.mxu1 }
  0xfb   :  { %v1564_v61 = vpop.eup %1563  ;;  %1128 = vst.msk [vmem:[%s2783_s3 + $0x20] sm:$0xff] %vm1123_vm3, %v1063_v60  ;;  %v1095_v58 = vsel %vm674_vm2, %v2103_v38, %v1562_v59  ;;  %1589 = vpow2.f32 %v1303_v25  ;;  %v1433_v54 = vpop.f32.mrf.mxu0  ;;  %v2309_v60 = vadd.f32 %v2253_v55, %v2058_v5  ;;  %v2319_v55 = vadd.f32 %v2058_v5, %v593_v10 }
  0xfc   :  { %v1566_v1 = vpop.eup %1565  ;;  %1160 = vst.msk [vmem:[%s2783_s3 + $0x120] sm:$0xff] %vm1123_vm3, %v1095_v58  ;;  %v1066_v37 = vsel %vm674_vm2, %v2109_v44, %v1564_v61  ;;  %1591 = vpow2.f32 %v1270_v48 }
  0xfd   :  { %v1568_v2 = vpop.eup %1567  ;;  %1131 = vst.msk [vmem:[%s2783_s3 + $0x38] sm:$0xff] %vm1123_vm3, %v1066_v37  ;;  %v1098_v38 = vsel %vm674_vm2, %v2112_v45, %v1566_v1  ;;  %1593 = vpow2.f32 %v1302_v53 }
  0xfe   :  { %v1570_v7 = vpop.eup %1569  ;;  %1163 = vst.msk [vmem:[%s2783_s3 + $0x138] sm:$0xff] %vm1123_vm3, %v1098_v38  ;;  %v1065_v44 = vsel %vm674_vm2, %v2116_v49, %v1568_v2  ;;  %1595 = vpow2.f32 %v1273_v33  ;;  %v1481_v33 = vpop.f32.mrf.mxu1 }
  0xff   :  { %v1572_v9 = vpop.eup %1571  ;;  %1130 = vst.msk [vmem:[%s2783_s3 + $0x30] sm:$0xff] %vm1123_vm3, %v1065_v44  ;;  %v1097_v45 = vsel %vm674_vm2, %v2119_v50, %v1570_v7  ;;  %1597 = vpow2.f32 %v1305_v0  ;;  %v2313_v0 = vadd.f32 %v2263_v57, %v2058_v5  ;;  %v2323_v57 = vadd.f32 %v1430_v14, %v2058_v5 }
 0x100   :  { %v1574_v12 = vpop.eup %1573  ;;  %1162 = vst.msk [vmem:[%s2783_s3 + $0x130] sm:$0xff] %vm1123_vm3, %v1097_v45  ;;  %v876_v49 = vadd.f32 1.0, %v1572_v9  ;;  %1599 = vpow2.f32 %v1272_v3  ;;  %v2316_v3 = vadd.f32 %v2058_v5, %v433_v6  ;;  %v1275_v9 = vmul.f32 -1.442695, %v2309_v60  ;;  %v613_v45 = vpop.f32.mrf.mxu1 }
 0x101   :  { %v1576_v13 = vpop.eup %1575  ;;  %v908_v16 = vadd.f32 1.0, %v1574_v12  ;;  %1601 = vpow2.f32 %v1304_v4  ;;  %v453_v4 = vpop.f32.mrf.mxu0  ;;  %v2334_v14 = vadd.f32 %v2058_v5, %v443_v31 }
 0x102   :  { %v1578_v18 = vpop.eup %1577  ;;  %1603 = vrcp.f32 %v876_v49  ;;  %v875_v19 = vadd.f32 1.0, %v1576_v13  ;;  %v1307_v49 = vmul.f32 -1.442695, %v2313_v0  ;;  %v2327_v13 = vadd.f32 %v1478_v22, %v2058_v5 }
 0x103   :  { %v1580_v23 = vpop.eup %1579  ;;  %1605 = vrcp.f32 %v908_v16  ;;  %v907_v50 = vadd.f32 1.0, %v1578_v18  ;;  %v1274_v18 = vmul.f32 -1.442695, %v2316_v3 }
 0x104   :  { %v1582_v27 = vpop.eup %1581  ;;  %1607 = vrcp.f32 %v875_v19  ;;  %v878_v28 = vadd.f32 1.0, %v1580_v23  ;;  %v1306_v23 = vmul.f32 -1.442695, %v2319_v55 }
 0x105   :  { %v1584_v29 = vpop.eup %1583  ;;  %1609 = vrcp.f32 %v907_v50  ;;  %v910_v30 = vadd.f32 1.0, %v1582_v27  ;;  %v1436_v50 = vpop.f32.mrf.mxu0 }
 0x106   :  { %v1586_v21 = vpop.eup %1585  ;;  %1611 = vrcp.f32 %v878_v28  ;;  %v877_v36 = vadd.f32 1.0, %v1584_v29  ;;  %v2356_v29 = vadd.f32 %v1433_v54, %v2058_v5 }
 0x107   :  { %v1588_v40 = vpop.eup %1587  ;;  %1613 = vrcp.f32 %v910_v30  ;;  %v909_v25 = vadd.f32 1.0, %v1586_v21  ;;  %v1484_v30 = vpop.f32.mrf.mxu1 }
 0x108   :  { %v1590_v43 = vpop.eup %1589  ;;  %1615 = vrcp.f32 %v877_v36  ;;  %v880_v47 = vadd.f32 1.0, %v1588_v40  ;;  %v2367_v36 = vadd.f32 %v1481_v33, %v2058_v5 }
 0x109   :  { %v1592_v48 = vpop.eup %1591  ;;  %1617 = vrcp.f32 %v909_v25  ;;  %v912_v52 = vadd.f32 1.0, %v1590_v43  ;;  %v1276_v25 = vmul.f32 -1.442695, %v2334_v14  ;;  %v623_v33 = vpop.f32.mrf.mxu1 }
 0x10a   :  { %v1594_v53 = vpop.eup %1593  ;;  %1619 = vrcp.f32 %v880_v47  ;;  %v879_v59 = vadd.f32 1.0, %v1592_v48 }
 0x10b   :  { %v1596_v61 = vpop.eup %1595  ;;  %1621 = vrcp.f32 %v912_v52  ;;  %v911_v58 = vadd.f32 1.0, %v1594_v53  ;;  %v463_v52 = vpop.f32.mrf.mxu0 }
 0x10c   :  { %v1598_v1 = vpop.eup %1597  ;;  %1623 = vrcp.f32 %v879_v59  ;;  %v882_v37 = vadd.f32 1.0, %v1596_v61  ;;  %v2400_v59 = vadd.f32 %v1436_v50, %v2058_v5 }
 0x10d   :  { %v1600_v2 = vpop.eup %1599  ;;  %1625 = vrcp.f32 %v911_v58  ;;  %v914_v38 = vadd.f32 1.0, %v1598_v1  ;;  %v2411_v1 = vadd.f32 %v1484_v30, %v2058_v5 }
 0x10e   :  { %v1602_v7 = vpop.eup %1601  ;;  %1627 = vrcp.f32 %v882_v37  ;;  %v881_v44 = vadd.f32 1.0, %v1600_v2 }
 0x10f   :  { %v1604_v12 = vpop.eup %1603  ;;  %1629 = vrcp.f32 %v914_v38  ;;  %v913_v6 = vadd.f32 1.0, %v1602_v7 }
 0x110   :  { %v1606_v10 = vpop.eup %1605  ;;  %v1068_v16 = vsel %vm674_vm2, %v2127_v35, %v1604_v12  ;;  %1631 = vrcp.f32 %v881_v44  ;;  %v2345_v35 = vadd.f32 %v2058_v5, %v603_v39 }
 0x111   :  { %v1608_v19 = vpop.eup %1607  ;;  %1133 = vst.msk [vmem:[%s2783_s3 + $0x48] sm:$0xff] %vm1123_vm3, %v1068_v16  ;;  %v1100_v22 = vsel %vm674_vm2, %v2130_v41, %v1606_v10  ;;  %1633 = vrcp.f32 %v913_v6  ;;  %v1277_v41 = vmul.f32 -1.442695, %v2323_v57  ;;  %v2445_v6 = vpop.f32.mrf.mxu1  ;;  %v1313_v16 = vmul.f32 -1.442695, %v2411_v1 }
 0x112   :  { %v1610_v27 = vpop.eup %1609  ;;  %1165 = vst.msk [vmem:[%s2783_s3 + $0x148] sm:$0xff] %vm1123_vm3, %v1100_v22  ;;  %v1067_v28 = vsel %vm674_vm2, %v2134_v46, %v1608_v19  ;;  %1635 = vpow2.f32 %v1275_v9  ;;  %v1309_v46 = vmul.f32 -1.442695, %v2327_v13  ;;  %v1308_v48 = vmul.f32 -1.442695, %v2345_v35  ;;  %v2435_v9 = vpop.f32.mrf.mxu0 }
 0x113   :  { %v1612_v31 = vpop.eup %1611  ;;  %1132 = vst.msk [vmem:[%s2783_s3 + $0x40] sm:$0xff] %vm1123_vm3, %v1067_v28  ;;  %v1099_v21 = vsel %vm674_vm2, %v2137_v51, %v1610_v27  ;;  %1637 = vpow2.f32 %v1307_v49  ;;  %v2378_v51 = vadd.f32 %v2058_v5, %v453_v4  ;;  %v633_v28 = vpop.f32.mrf.mxu1 }
 0x114   :  { %v1614_v39 = vpop.eup %1613  ;;  %1164 = vst.msk [vmem:[%s2783_s3 + $0x140] sm:$0xff] %vm1123_vm3, %v1099_v21  ;;  %v1070_v40 = vsel %vm674_vm2, %v2141_v56, %v1612_v31  ;;  %1639 = vpow2.f32 %v1274_v18  ;;  %v2389_v56 = vadd.f32 %v2058_v5, %v613_v45  ;;  %v473_v50 = vpop.f32.mrf.mxu0 }
 0x115   :  { %v1616_v43 = vpop.eup %1615  ;;  %1135 = vst.msk [vmem:[%s2783_s3 + $0x58] sm:$0xff] %vm1123_vm3, %v1070_v40  ;;  %v1102_v47 = vsel %vm674_vm2, %v2145_v62, %v1614_v39  ;;  %1641 = vpow2.f32 %v1306_v23  ;;  %v1279_v62 = vmul.f32 -1.442695, %v2356_v29  ;;  %v1278_v38 = vmul.f32 -1.442695, %v2378_v51 }
 0x116   :  { %v1618_v54 = vpop.eup %1617  ;;  %1167 = vst.msk [vmem:[%s2783_s3 + $0x158] sm:$0xff] %vm1123_vm3, %v1102_v47  ;;  %v1069_v53 = vsel %vm674_vm2, %v2152_v63, %v1616_v43  ;;  %1643 = vpow2.f32 %v1277_v41  ;;  %v1311_v63 = vmul.f32 -1.442695, %v2367_v36  ;;  %v1310_v44 = vmul.f32 -1.442695, %v2389_v56 }
 0x117   :  { %v1620_v61 = vpop.eup %1619  ;;  %1134 = vst.msk [vmem:[%s2783_s3 + $0x50] sm:$0xff] %vm1123_vm3, %v1069_v53  ;;  %v1101_v58 = vsel %vm674_vm2, %v2163_v8, %v1618_v54  ;;  %1645 = vpow2.f32 %v1309_v46  ;;  %v2422_v8 = vadd.f32 %v2058_v5, %v463_v52  ;;  %v1442_v46 = vpop.f32.mrf.mxu0 }
 0x118   :  { %v1622_v37 = vpop.eup %1621  ;;  %1166 = vst.msk [vmem:[%s2783_s3 + $0x150] sm:$0xff] %vm1123_vm3, %v1101_v58  ;;  %v1072_v2 = vsel %vm674_vm2, %v2174_v11, %v1620_v61  ;;  %1647 = vpow2.f32 %v1276_v25  ;;  %v2433_v11 = vadd.f32 %v2058_v5, %v623_v33  ;;  %v1490_v25 = vpop.f32.mrf.mxu1 }
 0x119   :  { %v1624_v4 = vpop.eup %1623  ;;  %1137 = vst.msk [vmem:[%s2783_s3 + $0x68] sm:$0xff] %vm1123_vm3, %v1072_v2  ;;  %v1104_v7 = vsel %vm674_vm2, %v2185_v17, %v1622_v37  ;;  %1649 = vpow2.f32 %v1308_v48  ;;  %v1281_v17 = vmul.f32 -1.442695, %v2400_v59  ;;  %v1280_v19 = vmul.f32 -1.442695, %v2422_v8  ;;  %v483_v53 = vpop.f32.mrf.mxu0 }
 0x11a   :  { %v1626_v45 = vpop.eup %1625  ;;  %1169 = vst.msk [vmem:[%s2783_s3 + $0x168] sm:$0xff] %vm1123_vm3, %v1104_v7  ;;  %v1071_v12 = vsel %vm674_vm2, %v2196_v15, %v1624_v4  ;;  %1651 = vpow2.f32 %v1279_v62  ;;  %v1312_v23 = vmul.f32 -1.442695, %v2433_v11  ;;  %v643_v61 = vpop.f32.mrf.mxu1 }
 0x11b   :  { %v1628_v49 = vpop.eup %1627  ;;  %1136 = vst.msk [vmem:[%s2783_s3 + $0x60] sm:$0xff] %vm1123_vm3, %v1071_v12  ;;  %v1103_v10 = vsel %vm674_vm2, %v2207_v20, %v1626_v45  ;;  %1653 = vpow2.f32 %v1311_v63  ;;  %v1445_v7 = vpop.f32.mrf.mxu0  ;;  %v2491_v12 = vadd.f32 %v2435_v9, %v2058_v5  ;;  %v2501_v9 = vadd.f32 %v2058_v5, %v633_v28 }
 0x11c   :  { %v1630_v18 = vpop.eup %1629  ;;  %1168 = vst.msk [vmem:[%s2783_s3 + $0x160] sm:$0xff] %vm1123_vm3, %v1103_v10  ;;  %v1074_v15 = vsel %vm674_vm2, %v2218_v34, %v1628_v49  ;;  %1655 = vpow2.f32 %v1278_v38 }
 0x11d   :  { %v1632_v22 = vpop.eup %1631  ;;  %1139 = vst.msk [vmem:[%s2783_s3 + $0x78] sm:$0xff] %vm1123_vm3, %v1074_v15  ;;  %v1106_v20 = vsel %vm674_vm2, %v2229_v42, %v1630_v18  ;;  %1657 = vpow2.f32 %v1310_v44 }
 0x11e   :  { %v1634_v27 = vpop.eup %1633  ;;  %1171 = vst.msk [vmem:[%s2783_s3 + $0x178] sm:$0xff] %vm1123_vm3, %v1106_v20  ;;  %v1073_v34 = vsel %vm674_vm2, %v2240_v26, %v1632_v22  ;;  %1659 = vpow2.f32 %v1281_v17  ;;  %v1493_v17 = vpop.f32.mrf.mxu1 }
 0x11f   :  { %v1636_v41 = vpop.eup %1635  ;;  %1138 = vst.msk [vmem:[%s2783_s3 + $0x70] sm:$0xff] %vm1123_vm3, %v1073_v34  ;;  %v1105_v42 = vsel %vm674_vm2, %v2251_v32, %v1634_v27  ;;  %1661 = vpow2.f32 %v1313_v16  ;;  %v2495_v16 = vadd.f32 %v2445_v6, %v2058_v5  ;;  %v2505_v6 = vadd.f32 %v1442_v46, %v2058_v5 }
 0x120   :  { %v1638_v30 = vpop.eup %1637  ;;  %1170 = vst.msk [vmem:[%s2783_s3 + $0x170] sm:$0xff] %vm1123_vm3, %v1105_v42  ;;  %v884_v26 = vadd.f32 1.0, %v1636_v41  ;;  %1663 = vpow2.f32 %v1280_v19  ;;  %v2498_v19 = vadd.f32 %v2058_v5, %v473_v50  ;;  %v1283_v41 = vmul.f32 -1.442695, %v2491_v12  ;;  %v653_v42 = vpop.f32.mrf.mxu1 }
 0x121   :  { %v1640_v31 = vpop.eup %1639  ;;  %v916_v21 = vadd.f32 1.0, %v1638_v30  ;;  %1665 = vpow2.f32 %v1312_v23  ;;  %v493_v23 = vpop.f32.mrf.mxu0  ;;  %v2516_v46 = vadd.f32 %v2058_v5, %v483_v53 }
 0x122   :  { %v1642_v39 = vpop.eup %1641  ;;  %1667 = vrcp.f32 %v884_v26  ;;  %v883_v40 = vadd.f32 1.0, %v1640_v31  ;;  %v1315_v26 = vmul.f32 -1.442695, %v2495_v16  ;;  %v2509_v31 = vadd.f32 %v1490_v25, %v2058_v5 }
 0x123   :  { %v1644_v43 = vpop.eup %1643  ;;  %1669 = vrcp.f32 %v916_v21  ;;  %v915_v32 = vadd.f32 1.0, %v1642_v39  ;;  %v1282_v39 = vmul.f32 -1.442695, %v2498_v19 }
 0x124   :  { %v1646_v47 = vpop.eup %1645  ;;  %1671 = vrcp.f32 %v883_v40  ;;  %v886_v48 = vadd.f32 1.0, %v1644_v43  ;;  %v1314_v43 = vmul.f32 -1.442695, %v2501_v9 }
 0x125   :  { %v1648_v52 = vpop.eup %1647  ;;  %1673 = vrcp.f32 %v915_v32  ;;  %v918_v54 = vadd.f32 1.0, %v1646_v47  ;;  %v1448_v32 = vpop.f32.mrf.mxu0 }
 0x126   :  { %v1650_v62 = vpop.eup %1649  ;;  %1675 = vrcp.f32 %v886_v48  ;;  %v885_v33 = vadd.f32 1.0, %v1648_v52  ;;  %v2538_v52 = vadd.f32 %v1445_v7, %v2058_v5 }
 0x127   :  { %v1652_v58 = vpop.eup %1651  ;;  %1677 = vrcp.f32 %v918_v54  ;;  %v917_v63 = vadd.f32 1.0, %v1650_v62  ;;  %v1496_v54 = vpop.f32.mrf.mxu1 }
 0x128   :  { %v1654_v37 = vpop.eup %1653  ;;  %1679 = vrcp.f32 %v885_v33  ;;  %v888_v2 = vadd.f32 1.0, %v1652_v58  ;;  %v2549_v33 = vadd.f32 %v1493_v17, %v2058_v5 }
 0x129   :  { %v1656_v38 = vpop.eup %1655  ;;  %1681 = vrcp.f32 %v917_v63  ;;  %v920_v4 = vadd.f32 1.0, %v1654_v37  ;;  %v1284_v63 = vmul.f32 -1.442695, %v2516_v46  ;;  %v663_v17 = vpop.f32.mrf.mxu1 }
 0x12a   :  { %v1658_v44 = vpop.eup %1657  ;;  %1683 = vrcp.f32 %v888_v2  ;;  %v887_v45 = vadd.f32 1.0, %v1656_v38 }
 0x12b   :  { %v1660_v49 = vpop.eup %1659  ;;  %1685 = vrcp.f32 %v920_v4  ;;  %v919_v10 = vadd.f32 1.0, %v1658_v44  ;;  %v503_v4 = vpop.f32.mrf.mxu0 }
 0x12c   :  { %v1662_v18 = vpop.eup %1661  ;;  %1687 = vrcp.f32 %v887_v45  ;;  %v890_v15 = vadd.f32 1.0, %v1660_v49  ;;  %v2582_v45 = vadd.f32 %v1448_v32, %v2058_v5 }
 0x12d   :  { %v1664_v22 = vpop.eup %1663  ;;  %1689 = vrcp.f32 %v919_v10  ;;  %v922_v20 = vadd.f32 1.0, %v1662_v18  ;;  %v2593_v18 = vadd.f32 %v1496_v54, %v2058_v5 }
 0x12e   :  { %v1666_v27 = vpop.eup %1665  ;;  %1691 = vrcp.f32 %v890_v15  ;;  %v889_v34 = vadd.f32 1.0, %v1664_v22 }
 0x12f   :  { %v1668_v30 = vpop.eup %1667  ;;  %1693 = vrcp.f32 %v922_v20  ;;  %v921_v50 = vadd.f32 1.0, %v1666_v27 }
 0x130   :  { %v1670_v28 = vpop.eup %1669  ;;  %v1076_v21 = vsel %vm674_vm2, %v2309_v60, %v1668_v30  ;;  %1695 = vrcp.f32 %v889_v34  ;;  %v2527_v60 = vadd.f32 %v2058_v5, %v643_v61  ;;  %v1289_v30 = vmul.f32 -1.442695, %v2582_v45 }
 0x131   :  { %v1672_v40 = vpop.eup %1671  ;;  %1141 = vst.msk [vmem:[%s2783_s3 + $0x88] sm:$0xff] %vm1123_vm3, %v1076_v21  ;;  %v1108_v25 = vsel %vm674_vm2, %v2313_v0, %v1670_v28  ;;  %1697 = vrcp.f32 %v921_v50  ;;  %v1285_v0 = vmul.f32 -1.442695, %v2505_v6 }
 0x132   :  { %v1674_v47 = vpop.eup %1673  ;;  %1173 = vst.msk [vmem:[%s2783_s3 + $0x188] sm:$0xff] %vm1123_vm3, %v1108_v25  ;;  %v1075_v48 = vsel %vm674_vm2, %v2316_v3, %v1672_v40  ;;  %1699 = vpow2.f32 %v1283_v41  ;;  %v1317_v3 = vmul.f32 -1.442695, %v2509_v31  ;;  %v1316_v38 = vmul.f32 -1.442695, %v2527_v60 }
 0x133   :  { %v1676_v53 = vpop.eup %1675  ;;  %1140 = vst.msk [vmem:[%s2783_s3 + $0x80] sm:$0xff] %vm1123_vm3, %v1075_v48  ;;  %v1107_v62 = vsel %vm674_vm2, %v2319_v55, %v1674_v47  ;;  %1701 = vpow2.f32 %v1315_v26  ;;  %v2560_v55 = vadd.f32 %v2058_v5, %v493_v23  ;;  %v1321_v26 = vmul.f32 -1.442695, %v2593_v18 }
 0x134   :  { %v1678_v61 = vpop.eup %1677  ;;  %1172 = vst.msk [vmem:[%s2783_s3 + $0x180] sm:$0xff] %vm1123_vm3, %v1107_v62  ;;  %v1078_v58 = vsel %vm674_vm2, %v2323_v57, %v1676_v53  ;;  %1703 = vpow2.f32 %v1282_v39  ;;  %v2571_v57 = vadd.f32 %v2058_v5, %v653_v42 }
 0x135   :  { %v1680_v37 = vpop.eup %1679  ;;  %1143 = vst.msk [vmem:[%s2783_s3 + $0x98] sm:$0xff] %vm1123_vm3, %v1078_v58  ;;  %v1110_v2 = vsel %vm674_vm2, %v2327_v13, %v1678_v61  ;;  %1705 = vpow2.f32 %v1314_v43  ;;  %v1287_v13 = vmul.f32 -1.442695, %v2538_v52  ;;  %v1286_v20 = vmul.f32 -1.442695, %v2560_v55 }
 0x136   :  { %v1682_v7 = vpop.eup %1681  ;;  %1175 = vst.msk [vmem:[%s2783_s3 + $0x198] sm:$0xff] %vm1123_vm3, %v1110_v2  ;;  %v1077_v44 = vsel %vm674_vm2, %v2334_v14, %v1680_v37  ;;  %1707 = vpow2.f32 %v1285_v0  ;;  %v1319_v14 = vmul.f32 -1.442695, %v2549_v33 }
 0x137   :  { %v1684_v49 = vpop.eup %1683  ;;  %1142 = vst.msk [vmem:[%s2783_s3 + $0x90] sm:$0xff] %vm1123_vm3, %v1077_v44  ;;  %v1109_v10 = vsel %vm674_vm2, %v2345_v35, %v1682_v7  ;;  %1709 = vpow2.f32 %v1317_v3  ;;  %v1763_v35 = vld [vmem:[%s2782_s2] ss:$0 sm:$0xff] }
 0x138   :  { %v1686_v15 = vpop.eup %1685  ;;  %1174 = vst.msk [vmem:[%s2783_s3 + $0x190] sm:$0xff] %vm1123_vm3, %v1109_v10  ;;  %v1080_v22 = vsel %vm674_vm2, %v2356_v29, %v1684_v49  ;;  %1711 = vpow2.f32 %v1284_v63  ;;  %v2606_v23 = vadd.f32 %v1763_v35, %v503_v4  ;;  %v1318_v29 = vmul.f32 -1.442695, %v2571_v57 }
 0x139   :  { %v1688_v5 = vpop.eup %1687  ;;  %1145 = vst.msk [vmem:[%s2783_s3 + $0xa8] sm:$0xff] %vm1123_vm3, %v1080_v22  ;;  %v1112_v27 = vsel %vm674_vm2, %v2367_v36, %v1686_v15  ;;  %1713 = vpow2.f32 %v1316_v38  ;;  %v2616_v34 = vadd.f32 %v1763_v35, %v663_v17 }
 0x13a   :  { %v1690_v41 = vpop.eup %1689  ;;  %1177 = vst.msk [vmem:[%s2783_s3 + $0x1a8] sm:$0xff] %vm1123_vm3, %v1112_v27  ;;  %v1079_v42 = vsel %vm674_vm2, %v2378_v51, %v1688_v5  ;;  %1715 = vpow2.f32 %v1287_v13  ;;  %v1288_v21 = vmul.f32 -1.442695, %v2606_v23 }
 0x13b   :  { %v1692_v50 = vpop.eup %1691  ;;  %1144 = vst.msk [vmem:[%s2783_s3 + $0xa0] sm:$0xff] %vm1123_vm3, %v1079_v42  ;;  %v1111_v36 = vsel %vm674_vm2, %v2389_v56, %v1690_v41  ;;  %1717 = vpow2.f32 %v1319_v14  ;;  %v1320_v40 = vmul.f32 -1.442695, %v2616_v34 }
 0x13c   :  { %v1694_v28 = vpop.eup %1693  ;;  %1176 = vst.msk [vmem:[%s2783_s3 + $0x1a0] sm:$0xff] %vm1123_vm3, %v1111_v36  ;;  %v1082_v51 = vsel %vm674_vm2, %v2400_v59, %v1692_v50  ;;  %1719 = vpow2.f32 %v1286_v20 }
 0x13d   :  { %v1696_v39 = vpop.eup %1695  ;;  %1147 = vst.msk [vmem:[%s2783_s3 + $0xb8] sm:$0xff] %vm1123_vm3, %v1082_v51  ;;  %v1114_v56 = vsel %vm674_vm2, %v2411_v1, %v1694_v28  ;;  %1721 = vpow2.f32 %v1318_v29 }
 0x13e   :  { %v1698_v25 = vpop.eup %1697  ;;  %1179 = vst.msk [vmem:[%s2783_s3 + $0x1b8] sm:$0xff] %vm1123_vm3, %v1114_v56  ;;  %v1081_v59 = vsel %vm674_vm2, %v2422_v8, %v1696_v39  ;;  %1723 = vpow2.f32 %v1289_v30 }
 0x13f   :  { %v1700_v43 = vpop.eup %1699  ;;  %1146 = vst.msk [vmem:[%s2783_s3 + $0xb0] sm:$0xff] %vm1123_vm3, %v1081_v59  ;;  %v1113_v1 = vsel %vm674_vm2, %v2433_v11, %v1698_v25  ;;  %1725 = vpow2.f32 %v1321_v26 }
 0x140   :  { %v1702_v32 = vpop.eup %1701  ;;  %1178 = vst.msk [vmem:[%s2783_s3 + $0x1b0] sm:$0xff] %vm1123_vm3, %v1113_v1  ;;  %v892_v47 = vadd.f32 1.0, %v1700_v43  ;;  %1727 = vpow2.f32 %v1288_v21 }
 0x141   :  { %v1704_v8 = vpop.eup %1703  ;;  %v924_v48 = vadd.f32 1.0, %v1702_v32  ;;  %1729 = vpow2.f32 %v1320_v40 }
 0x142   :  { %v1706_v0 = vpop.eup %1705  ;;  %1731 = vrcp.f32 %v892_v47  ;;  %v891_v54 = vadd.f32 1.0, %v1704_v8 }
 0x143   :  { %v1708_v53 = vpop.eup %1707  ;;  %1733 = vrcp.f32 %v924_v48  ;;  %v923_v62 = vadd.f32 1.0, %v1706_v0 }
 0x144   :  { %v1710_v3 = vpop.eup %1709  ;;  %1735 = vrcp.f32 %v891_v54  ;;  %v894_v11 = vadd.f32 1.0, %v1708_v53 }
 0x145   :  { %v1712_v61 = vpop.eup %1711  ;;  %1737 = vrcp.f32 %v923_v62  ;;  %v926_v58 = vadd.f32 1.0, %v1710_v3 }
 0x146   :  { %v1714_v63 = vpop.eup %1713  ;;  %1739 = vrcp.f32 %v894_v11  ;;  %v893_v37 = vadd.f32 1.0, %v1712_v61 }
 0x147   :  { %v1716_v2 = vpop.eup %1715  ;;  %1741 = vrcp.f32 %v926_v58  ;;  %v925_v38 = vadd.f32 1.0, %v1714_v63 }
 0x148   :  { %v1718_v4 = vpop.eup %1717  ;;  %1743 = vrcp.f32 %v893_v37  ;;  %v896_v7 = vadd.f32 1.0, %v1716_v2 }
 0x149   :  { %v1720_v44 = vpop.eup %1719  ;;  %1745 = vrcp.f32 %v925_v38  ;;  %v928_v13 = vadd.f32 1.0, %v1718_v4 }
 0x14a   :  { %v1722_v17 = vpop.eup %1721  ;;  %1747 = vrcp.f32 %v896_v7  ;;  %v895_v49 = vadd.f32 1.0, %v1720_v44 }
 0x14b   :  { %v1724_v10 = vpop.eup %1723  ;;  %1749 = vrcp.f32 %v928_v13  ;;  %v927_v14 = vadd.f32 1.0, %v1722_v17 }
 0x14c   :  { %v1726_v15 = vpop.eup %1725  ;;  %1751 = vrcp.f32 %v895_v49  ;;  %v898_v22 = vadd.f32 1.0, %v1724_v10 }
 0x14d   :  { %v1728_v20 = vpop.eup %1727  ;;  %1753 = vrcp.f32 %v927_v14  ;;  %v930_v35 = vadd.f32 1.0, %v1726_v15 }
 0x14e   :  { %v1730_v5 = vpop.eup %1729  ;;  %1755 = vrcp.f32 %v898_v22  ;;  %v897_v27 = vadd.f32 1.0, %v1728_v20 }
 0x14f   :  { %v1732_v29 = vpop.eup %1731  ;;  %1757 = vrcp.f32 %v930_v35  ;;  %v929_v41 = vadd.f32 1.0, %v1730_v5 }
 0x150   :  { %v1734_v42 = vpop.eup %1733  ;;  %v1084_v30 = vsel %vm674_vm2, %v2491_v12, %v1732_v29  ;;  %1759 = vrcp.f32 %v897_v27 }
 0x151   :  { %v1736_v50 = vpop.eup %1735  ;;  %1149 = vst.msk [vmem:[%s2783_s3 + $0xc8] sm:$0xff] %vm1123_vm3, %v1084_v30  ;;  %v1116_v36 = vsel %vm674_vm2, %v2495_v16, %v1734_v42  ;;  %1761 = vrcp.f32 %v929_v41 }
 0x152   :  { %v1738_v26 = vpop.eup %1737  ;;  %1181 = vst.msk [vmem:[%s2783_s3 + $0x1c8] sm:$0xff] %vm1123_vm3, %v1116_v36  ;;  %v1083_v12 = vsel %vm674_vm2, %v2498_v19, %v1736_v50 }
 0x153   :  { %v1740_v28 = vpop.eup %1739  ;;  %1148 = vst.msk [vmem:[%s2783_s3 + $0xc0] sm:$0xff] %vm1123_vm3, %v1083_v12  ;;  %v1115_v16 = vsel %vm674_vm2, %v2501_v9, %v1738_v26 }
 0x154   :  { %v1742_v51 = vpop.eup %1741  ;;  %1180 = vst.msk [vmem:[%s2783_s3 + $0x1c0] sm:$0xff] %vm1123_vm3, %v1115_v16  ;;  %v1086_v19 = vsel %vm674_vm2, %v2505_v6, %v1740_v28 }
 0x155   :  { %v1744_v21 = vpop.eup %1743  ;;  %1151 = vst.msk [vmem:[%s2783_s3 + $0xd8] sm:$0xff] %vm1123_vm3, %v1086_v19  ;;  %v1118_v9 = vsel %vm674_vm2, %v2509_v31, %v1742_v51 }
 0x156   :  { %v1746_v39 = vpop.eup %1745  ;;  %1183 = vst.msk [vmem:[%s2783_s3 + $0x1d8] sm:$0xff] %vm1123_vm3, %v1118_v9  ;;  %v1085_v6 = vsel %vm674_vm2, %v2516_v46, %v1744_v21 }
 0x157   :  { %v1748_v56 = vpop.eup %1747  ;;  %1150 = vst.msk [vmem:[%s2783_s3 + $0xd0] sm:$0xff] %vm1123_vm3, %v1085_v6  ;;  %v1117_v31 = vsel %vm674_vm2, %v2527_v60, %v1746_v39 }
 0x158   :  { %v1750_v40 = vpop.eup %1749  ;;  %1182 = vst.msk [vmem:[%s2783_s3 + $0x1d0] sm:$0xff] %vm1123_vm3, %v1117_v31  ;;  %v1088_v46 = vsel %vm674_vm2, %v2538_v52, %v1748_v56 }
 0x159   :  { %v1752_v25 = vpop.eup %1751  ;;  %1153 = vst.msk [vmem:[%s2783_s3 + $0xe8] sm:$0xff] %vm1123_vm3, %v1088_v46  ;;  %v1120_v60 = vsel %vm674_vm2, %v2549_v33, %v1750_v40 }
 0x15a   :  { %v1754_v59 = vpop.eup %1753  ;;  %1185 = vst.msk [vmem:[%s2783_s3 + $0x1e8] sm:$0xff] %vm1123_vm3, %v1120_v60  ;;  %v1087_v52 = vsel %vm674_vm2, %v2560_v55, %v1752_v25 }
 0x15b   :  { %v1756_v43 = vpop.eup %1755  ;;  %1152 = vst.msk [vmem:[%s2783_s3 + $0xe0] sm:$0xff] %vm1123_vm3, %v1087_v52  ;;  %v1119_v33 = vsel %vm674_vm2, %v2571_v57, %v1754_v59 }
 0x15c   :  { %v1758_v1 = vpop.eup %1757  ;;  %1184 = vst.msk [vmem:[%s2783_s3 + $0x1e0] sm:$0xff] %vm1123_vm3, %v1119_v33  ;;  %v1090_v55 = vsel %vm674_vm2, %v2582_v45, %v1756_v43 }
 0x15d   :  { %v1760_v32 = vpop.eup %1759  ;;  %1155 = vst.msk [vmem:[%s2783_s3 + $0xf8] sm:$0xff] %vm1123_vm3, %v1090_v55  ;;  %v1122_v57 = vsel %vm674_vm2, %v2593_v18, %v1758_v1 }
 0x15e   :  { %v1762_v47 = vpop.eup %1761  ;;  %1187 = vst.msk [vmem:[%s2783_s3 + $0x1f8] sm:$0xff] %vm1123_vm3, %v1122_v57  ;;  %v1089_v45 = vsel %vm674_vm2, %v2606_v23, %v1760_v32 }
 0x15f   :  { %1154 = vst.msk [vmem:[%s2783_s3 + $0xf0] sm:$0xff] %vm1123_vm3, %v1089_v45  ;;  %v1121_v8 = vsel %vm674_vm2, %v2616_v34, %v1762_v47 }
 0x160   :  { %1186 = vst.msk [vmem:[%s2783_s3 + $0x1f0] sm:$0xff] %vm1123_vm3, %v1121_v8 }

</bundles_post_ra>
